<compile_context>
chip_gen: v5e
topology: v5e:2x2
jax: 0.10.0
libtpu: 0.0.40
codegen_flags: <defaults>
</compile_context>

<pallas_src>
import jax
import jax.numpy as jnp
from jax import lax
from jax.experimental import pallas as pl
from jax.experimental.pallas import tpu as pltpu


def intent_dec_kernel(rl_ref, x_ref, hs_ref, wx_ref, wh_ref, whh_ref, b_ref,
                      wfc_ref, bfc_ref, out_ref, gates_scr):
    """Batched input projection + LSTM recurrence + FC, one VMEM block.

    rl_ref    : (B, 1)       i32   real sequence lengths
    x_ref     : (S*B, 2H)    bf16  time-major flattened encoder output
    hs_ref    : (S*B, 2H)    bf16  time-major flattened shared hidden states
    wx_ref    : (2H, 4H)     bf16  W_ih[:, :2H].T   (x part)
    wh_ref    : (2H, 4H)     bf16  W_ih[:, 2H:].T   (hs part)
    whh_ref   : (H, 4H)      bf16  W_hh.T
    b_ref     : (1, 4H)      f32   b_ih + b_hh
    wfc_ref   : (H, Lp)      bf16  W_fc.T zero-padded to Lp lanes
    bfc_ref   : (1, Lp)      f32   b_fc zero-padded
    out_ref   : (B, Lp)      f32
    gates_scr : (S*B, 4H)    f32   VMEM scratch for the hoisted input projection
    """
    B = rl_ref.shape[0]
    H = whh_ref.shape[0]
    S = gates_scr.shape[0] // B

    # ---- (1) Input projection for ALL timesteps as one big GEMM (M = S*B), ----
    # bias folded in.  Removes the large (K=4H) matmul + bias broadcast from the
    # serial recurrence; keeps the MXU busy in one burst.
    gates_scr[...] = (
        jnp.dot(x_ref[...], wx_ref[...], preferred_element_type=jnp.float32)
        + jnp.dot(hs_ref[...], wh_ref[...], preferred_element_type=jnp.float32)
        + b_ref[...])

    # Loop-invariant hoists: (real_len - 1) and the recurrent weight load.
    rl_m1 = rl_ref[...] - 1                                    # (B, 1) i32
    whh = whh_ref[...]                                         # (H, 4H) bf16

    # ---- (2) Recurrence: only h @ W_hh.T + elementwise gates per step. -------
    def step(t, carry):
        h, c, state = carry                                    # (B, H) f32 each
        off = pl.multiple_of(t * B, B)
        gates = (gates_scr[pl.ds(off, B), :]
                 + jnp.dot(h.astype(jnp.bfloat16), whh,
                           preferred_element_type=jnp.float32))  # (B, 4H) f32
        # Full-width (lane-aligned) transcendentals; slices only feed VPU muls.
        sig = jax.nn.sigmoid(gates)
        tnh = jnp.tanh(gates)
        # PyTorch LSTM gate ordering: i, f, g, o
        i_g = sig[:, 0 * H:1 * H]
        f_g = sig[:, 1 * H:2 * H]
        g_g = tnh[:, 2 * H:3 * H]
        o_g = sig[:, 3 * H:4 * H]
        c_new = f_g * c + i_g * g_g
        h_new = o_g * jnp.tanh(c_new)
        # gather: keep h at timestep t == real_len[b] - 1 for each batch row
        state = jnp.where(rl_m1 == t, h_new, state)
        return h_new, c_new, state

    zeros = jnp.zeros((B, H), jnp.float32)
    _, _, state = lax.fori_loop(0, S, step, (zeros, zeros, zeros), unroll=True)

    # ---- (3) Final FC on the gathered state (lane-dense, padded output). -----
    out_ref[...] = (jnp.dot(state.astype(jnp.bfloat16), wfc_ref[...],
                            preferred_element_type=jnp.float32)
                    + bfc_ref[...]).astype(out_ref.dtype)


def intent_dec_forward(x, hs, real_len, params):
    """x, hs: (B, S, 2H) f32; real_len: (B,) int. Returns (B, label_size)."""
    B, S, twoH = x.shape
    H = twoH // 2
    L = params["w_fc"].shape[0]
    Lp = ((L + 127) // 128) * 128                     # lane-dense padded width

    # Time-major flatten, NO concat (W_ih is split into its x / hs column blocks).
    x_flat = jnp.transpose(x, (1, 0, 2)).reshape(S * B, twoH).astype(jnp.bfloat16)
    hs_flat = jnp.transpose(hs, (1, 0, 2)).reshape(S * B, twoH).astype(jnp.bfloat16)
    rl = jnp.asarray(real_len, jnp.int32).reshape(B, 1)

    w_ih = params["w_ih"]                              # (4H, 4H_in)
    wx_t = w_ih[:, :twoH].T.astype(jnp.bfloat16)       # (2H, 4H)   x part
    wh_t = w_ih[:, twoH:].T.astype(jnp.bfloat16)       # (2H, 4H)   hs part
    whh_t = params["w_hh"].T.astype(jnp.bfloat16)      # (H, 4H)
    b = (params["b_ih"] + params["b_hh"]).reshape(1, 4 * H).astype(jnp.float32)

    wfc_p = jnp.zeros((H, Lp), jnp.bfloat16).at[:, :L].set(
        params["w_fc"].T.astype(jnp.bfloat16))
    bfc_p = jnp.zeros((1, Lp), jnp.float32).at[:, :L].set(
        params["b_fc"].astype(jnp.float32).reshape(1, L))

    out = pl.pallas_call(
        intent_dec_kernel,
        out_shape=jax.ShapeDtypeStruct((B, Lp), jnp.float32),
        grid_spec=pltpu.PrefetchScalarGridSpec(
            num_scalar_prefetch=0,
            grid=(1,),
            in_specs=[
                pl.BlockSpec((B, 1), lambda i: (0, 0)),
                pl.BlockSpec((S * B, twoH), lambda i: (0, 0)),
                pl.BlockSpec((S * B, twoH), lambda i: (0, 0)),
                pl.BlockSpec((twoH, 4 * H), lambda i: (0, 0)),
                pl.BlockSpec((twoH, 4 * H), lambda i: (0, 0)),
                pl.BlockSpec((H, 4 * H), lambda i: (0, 0)),
                pl.BlockSpec((1, 4 * H), lambda i: (0, 0)),
                pl.BlockSpec((H, Lp), lambda i: (0, 0)),
                pl.BlockSpec((1, Lp), lambda i: (0, 0)),
            ],
            out_specs=pl.BlockSpec((B, Lp), lambda i: (0, 0)),
            scratch_shapes=[
                pltpu.VMEM((S * B, 4 * H), jnp.float32),   # hoisted input gates
            ],
        ),
        compiler_params=pltpu.CompilerParams(
            dimension_semantics=("arbitrary",)),
    )(rl, x_flat, hs_flat, wx_t, wh_t, whh_t, b, wfc_p, bfc_p)
    return out[:, :L]


def intent_dec_reference(x, hs, real_len, params):
    """Pure-JAX reference mirroring the PyTorch forward (dropout = identity)."""
    B, S, twoH = x.shape
    H = twoH // 2
    xc = jnp.concatenate([x, hs], axis=-1)
    w_ih, w_hh = params["w_ih"], params["w_hh"]
    b = params["b_ih"] + params["b_hh"]
    hp = lax.Precision.HIGHEST

    def cell(carry, x_t):
        h, c = carry
        gates = (jnp.dot(x_t, w_ih.T, precision=hp)
                 + jnp.dot(h, w_hh.T, precision=hp) + b)
        i = jax.nn.sigmoid(gates[:, :H])
        f = jax.nn.sigmoid(gates[:, H:2 * H])
        g = jnp.tanh(gates[:, 2 * H:3 * H])
        o = jax.nn.sigmoid(gates[:, 3 * H:])
        c = f * c + i * g
        h = o * jnp.tanh(c)
        return (h, c), h

    h0 = jnp.zeros((B, H), jnp.float32)
    (_, _), outs = lax.scan(cell, (h0, h0), jnp.transpose(xc, (1, 0, 2)))
    outs = jnp.transpose(outs, (1, 0, 2))                        # (B, S, H)
    state = outs[jnp.arange(B), jnp.asarray(real_len) - 1, :]
    return jnp.dot(state, params["w_fc"].T, precision=hp) + params["b_fc"]


def init_params(key, hidden, label_size):
    """Deterministic init matching the nn.LSTM / nn.Linear shapes."""
    k = 1.0 / jnp.sqrt(hidden)
    ks = jax.random.split(key, 6)
    u = lambda kk, shape: jax.random.uniform(kk, shape, jnp.float32, -k, k)
    return {
        "w_ih": u(ks[0], (4 * hidden, 4 * hidden)),   # weight_ih_l0
        "w_hh": u(ks[1], (4 * hidden, hidden)),       # weight_hh_l0
        "b_ih": u(ks[2], (4 * hidden,)),
        "b_hh": u(ks[3], (4 * hidden,)),
        "w_fc": u(ks[4], (label_size, hidden)),
        "b_fc": u(ks[5], (label_size,)),
    }


if __name__ == "__main__":
    B, S, H = 2, 8, 32          # batch, seq, lstm_hidden_size
    LABEL = 1                   # label_size (module default)

    key = jax.random.PRNGKey(0)
    kx, khs, kp = jax.random.split(key, 3)
    x = jax.random.normal(kx, (B, S, 2 * H), jnp.float32)    # encoder output (2H = bi-dir)
    hs = jax.random.normal(khs, (B, S, 2 * H), jnp.float32)  # shared hidden states
    real_len = jnp.array([5, 8], jnp.int32)
    params = init_params(kp, H, LABEL)

    out = intent_dec_forward(x, hs, real_len, params)
    out = jax.block_until_ready(out)

    ref = jax.block_until_ready(intent_dec_reference(x, hs, real_len, params))
    assert out.shape == (B, LABEL), out.shape
    assert jnp.allclose(out, ref, atol=5e-2, rtol=5e-2), (out, ref)

    print("KERNEL_OK")
</pallas_src>

<mosaic_0001>
module attributes {stable_mosaic.version = 11 : i64} {
  func.func @intent_dec_kernel(%arg0: i32, %arg1: memref<2x1xi32, #tpu.memory_space<vmem>>, %arg2: memref<16x64xbf16, #tpu.memory_space<vmem>>, %arg3: memref<16x64xbf16, #tpu.memory_space<vmem>>, %arg4: memref<64x128xbf16, #tpu.memory_space<vmem>>, %arg5: memref<64x128xbf16, #tpu.memory_space<vmem>>, %arg6: memref<32x128xbf16, #tpu.memory_space<vmem>>, %arg7: memref<1x128xf32, #tpu.memory_space<vmem>>, %arg8: memref<32x128xbf16, #tpu.memory_space<vmem>>, %arg9: memref<1x128xf32, #tpu.memory_space<vmem>>, %arg10: memref<2x128xf32, #tpu.memory_space<vmem>>, %arg11: memref<16x128xf32, #tpu.memory_space<vmem>>) attributes {dimension_semantics = [#tpu.dimension_semantics<arbitrary>], iteration_bounds = array<i64: 1>, scalar_prefetch = 0 : i64, scratch_operands = 1 : i64, tpu.core_type = #tpu.core_type<tc>, window_params = [{pipeline_mode = #tpu.pipeline_mode<synchronous>, transform_indices = @transform_0, window_bounds = array<i64: 2, 1>}, {pipeline_mode = #tpu.pipeline_mode<synchronous>, transform_indices = @transform_1, window_bounds = array<i64: 16, 64>}, {pipeline_mode = #tpu.pipeline_mode<synchronous>, transform_indices = @transform_2, window_bounds = array<i64: 16, 64>}, {pipeline_mode = #tpu.pipeline_mode<synchronous>, transform_indices = @transform_3, window_bounds = array<i64: 64, 128>}, {pipeline_mode = #tpu.pipeline_mode<synchronous>, transform_indices = @transform_4, window_bounds = array<i64: 64, 128>}, {pipeline_mode = #tpu.pipeline_mode<synchronous>, transform_indices = @transform_5, window_bounds = array<i64: 32, 128>}, {pipeline_mode = #tpu.pipeline_mode<synchronous>, transform_indices = @transform_6, window_bounds = array<i64: 1, 128>}, {pipeline_mode = #tpu.pipeline_mode<synchronous>, transform_indices = @transform_7, window_bounds = array<i64: 32, 128>}, {pipeline_mode = #tpu.pipeline_mode<synchronous>, transform_indices = @transform_8, window_bounds = array<i64: 1, 128>}, {pipeline_mode = #tpu.pipeline_mode<synchronous>, transform_indices = @transform_9, window_bounds = array<i64: 2, 128>}]} {
    %c0 = arith.constant 0 : index
    %c0_0 = arith.constant 0 : index
    %0 = vector.load %arg2[%c0, %c0_0] : memref<16x64xbf16, #tpu.memory_space<vmem>>, vector<16x64xbf16>
    %c0_1 = arith.constant 0 : index
    %c0_2 = arith.constant 0 : index
    %1 = vector.load %arg4[%c0_1, %c0_2] : memref<64x128xbf16, #tpu.memory_space<vmem>>, vector<64x128xbf16>
    %cst = arith.constant dense<0.000000e+00> : vector<16x128xf32>
    %2 = tpu.matmul %0, %1, %cst {dimension_numbers = #tpu.dot_dimension_numbers<[1], [0], [0], [1], [0, 0, 1, 1], [], []>} : vector<16x64xbf16>, vector<64x128xbf16>, vector<16x128xf32> -> vector<16x128xf32>
    %c0_3 = arith.constant 0 : index
    %c0_4 = arith.constant 0 : index
    %3 = vector.load %arg3[%c0_3, %c0_4] : memref<16x64xbf16, #tpu.memory_space<vmem>>, vector<16x64xbf16>
    %c0_5 = arith.constant 0 : index
    %c0_6 = arith.constant 0 : index
    %4 = vector.load %arg5[%c0_5, %c0_6] : memref<64x128xbf16, #tpu.memory_space<vmem>>, vector<64x128xbf16>
    %cst_7 = arith.constant dense<0.000000e+00> : vector<16x128xf32>
    %5 = tpu.matmul %3, %4, %cst_7 {dimension_numbers = #tpu.dot_dimension_numbers<[1], [0], [0], [1], [0, 0, 1, 1], [], []>} : vector<16x64xbf16>, vector<64x128xbf16>, vector<16x128xf32> -> vector<16x128xf32>
    %6 = arith.addf %2, %5 : vector<16x128xf32>
    %c0_8 = arith.constant 0 : index
    %c0_9 = arith.constant 0 : index
    %7 = vector.load %arg7[%c0_8, %c0_9] : memref<1x128xf32, #tpu.memory_space<vmem>>, vector<1x128xf32>
    %8 = vector.broadcast %7 : vector<1x128xf32> to vector<16x128xf32>
    %9 = arith.addf %6, %8 : vector<16x128xf32>
    %c0_10 = arith.constant 0 : index
    %c0_11 = arith.constant 0 : index
    %10 = vector.load %arg11[%c0_10, %c0_11] : memref<16x128xf32, #tpu.memory_space<vmem>>, vector<16x128xf32>
    tpu.vector_store %arg11[%c0_10, %c0_11], %9 {strides = array<i32>} : memref<16x128xf32, #tpu.memory_space<vmem>>, vector<16x128xf32>,
    %c0_12 = arith.constant 0 : index
    %c0_13 = arith.constant 0 : index
    %11 = vector.load %arg1[%c0_12, %c0_13] : memref<2x1xi32, #tpu.memory_space<vmem>>, vector<2x1xi32>
    %c1_i32 = arith.constant 1 : i32
    %12 = vector.broadcast %c1_i32 : i32 to vector<2x1xi32>
    %13 = arith.subi %11, %12 : vector<2x1xi32>
    %c0_14 = arith.constant 0 : index
    %c0_15 = arith.constant 0 : index
    %14 = vector.load %arg6[%c0_14, %c0_15] : memref<32x128xbf16, #tpu.memory_space<vmem>>, vector<32x128xbf16>
    %cst_16 = arith.constant 0.000000e+00 : f32
    %15 = vector.broadcast %cst_16 : f32 to vector<2x32xf32>
    %c0_i32 = arith.constant 0 : i32
    %c2_i32 = arith.constant 2 : i32
    %16 = arith.muli %c0_i32, %c2_i32 : i32
    %17 = tpu.assume_multiple %16, 2 : i32
    %18 = arith.index_cast %17 : i32 to index
    %c0_17 = arith.constant 0 : index
    %19 = vector.load %arg11[%18, %c0_17] : memref<16x128xf32, #tpu.memory_space<vmem>>, vector<2x128xf32>
    %20 = arith.truncf %15 : vector<2x32xf32> to vector<2x32xbf16>
    %cst_18 = arith.constant dense<0.000000e+00> : vector<2x128xf32>
    %21 = tpu.matmul %20, %14, %cst_18 {dimension_numbers = #tpu.dot_dimension_numbers<[1], [0], [0], [1], [0, 0, 1, 1], [], []>} : vector<2x32xbf16>, vector<32x128xbf16>, vector<2x128xf32> -> vector<2x128xf32>
    %22 = arith.addf %19, %21 : vector<2x128xf32>
    %23 = arith.negf %22 : vector<2x128xf32>
    %24 = math.exp %23 : vector<2x128xf32>
    %cst_19 = arith.constant 1.000000e+00 : f32
    %25 = vector.broadcast %cst_19 : f32 to vector<2x128xf32>
    %26 = arith.addf %25, %24 : vector<2x128xf32>
    %27 = arith.divf %25, %26 : vector<2x128xf32>
    %28 = math.tanh %22 : vector<2x128xf32>
    %29 = vector.extract_strided_slice %27 {offsets = [0, 0], sizes = [2, 32], strides = [1, 1]} : vector<2x128xf32> to vector<2x32xf32>
    %30 = vector.extract_strided_slice %27 {offsets = [0, 32], sizes = [2, 32], strides = [1, 1]} : vector<2x128xf32> to vector<2x32xf32>
    %31 = vector.extract_strided_slice %28 {offsets = [0, 64], sizes = [2, 32], strides = [1, 1]} : vector<2x128xf32> to vector<2x32xf32>
    %32 = vector.extract_strided_slice %27 {offsets = [0, 96], sizes = [2, 32], strides = [1, 1]} : vector<2x128xf32> to vector<2x32xf32>
    %33 = arith.mulf %30, %15 : vector<2x32xf32>
    %34 = arith.mulf %29, %31 : vector<2x32xf32>
    %35 = arith.addf %33, %34 : vector<2x32xf32>
    %36 = math.tanh %35 : vector<2x32xf32>
    %37 = arith.mulf %32, %36 : vector<2x32xf32>
    %38 = vector.broadcast %c0_i32 : i32 to vector<2x1xi32>
    %39 = arith.cmpi eq, %13, %38 : vector<2x1xi32>
    %40 = vector.shape_cast %39 : vector<2x1xi1> to vector<2x1xi1>
    %41 = vector.broadcast %40 : vector<2x1xi1> to vector<2x32xi1>
    %42 = arith.select %41, %37, %15 : vector<2x32xi1>, vector<2x32xf32>
    %c1_i32_20 = arith.constant 1 : i32
    %c2_i32_21 = arith.constant 2 : i32
    %43 = arith.muli %c1_i32_20, %c2_i32_21 : i32
    %44 = tpu.assume_multiple %43, 2 : i32
    %45 = arith.index_cast %44 : i32 to index
    %c0_22 = arith.constant 0 : index
    %46 = vector.load %arg11[%45, %c0_22] : memref<16x128xf32, #tpu.memory_space<vmem>>, vector<2x128xf32>
    %47 = arith.truncf %37 : vector<2x32xf32> to vector<2x32xbf16>
    %cst_23 = arith.constant dense<0.000000e+00> : vector<2x128xf32>
    %48 = tpu.matmul %47, %14, %cst_23 {dimension_numbers = #tpu.dot_dimension_numbers<[1], [0], [0], [1], [0, 0, 1, 1], [], []>} : vector<2x32xbf16>, vector<32x128xbf16>, vector<2x128xf32> -> vector<2x128xf32>
    %49 = arith.addf %46, %48 : vector<2x128xf32>
    %50 = arith.negf %49 : vector<2x128xf32>
    %51 = math.exp %50 : vector<2x128xf32>
    %cst_24 = arith.constant 1.000000e+00 : f32
    %52 = vector.broadcast %cst_24 : f32 to vector<2x128xf32>
    %53 = arith.addf %52, %51 : vector<2x128xf32>
    %54 = arith.divf %52, %53 : vector<2x128xf32>
    %55 = math.tanh %49 : vector<2x128xf32>
    %56 = vector.extract_strided_slice %54 {offsets = [0, 0], sizes = [2, 32], strides = [1, 1]} : vector<2x128xf32> to vector<2x32xf32>
    %57 = vector.extract_strided_slice %54 {offsets = [0, 32], sizes = [2, 32], strides = [1, 1]} : vector<2x128xf32> to vector<2x32xf32>
    %58 = vector.extract_strided_slice %55 {offsets = [0, 64], sizes = [2, 32], strides = [1, 1]} : vector<2x128xf32> to vector<2x32xf32>
    %59 = vector.extract_strided_slice %54 {offsets = [0, 96], sizes = [2, 32], strides = [1, 1]} : vector<2x128xf32> to vector<2x32xf32>
    %60 = arith.mulf %57, %35 : vector<2x32xf32>
    %61 = arith.mulf %56, %58 : vector<2x32xf32>
    %62 = arith.addf %60, %61 : vector<2x32xf32>
    %63 = math.tanh %62 : vector<2x32xf32>
    %64 = arith.mulf %59, %63 : vector<2x32xf32>
    %65 = vector.broadcast %c1_i32_20 : i32 to vector<2x1xi32>
    %66 = arith.cmpi eq, %13, %65 : vector<2x1xi32>
    %67 = vector.shape_cast %66 : vector<2x1xi1> to vector<2x1xi1>
    %68 = vector.broadcast %67 : vector<2x1xi1> to vector<2x32xi1>
    %69 = arith.select %68, %64, %42 : vector<2x32xi1>, vector<2x32xf32>
    %c2_i32_25 = arith.constant 2 : i32
    %c2_i32_26 = arith.constant 2 : i32
    %70 = arith.muli %c2_i32_25, %c2_i32_26 : i32
    %71 = tpu.assume_multiple %70, 2 : i32
    %72 = arith.index_cast %71 : i32 to index
    %c0_27 = arith.constant 0 : index
    %73 = vector.load %arg11[%72, %c0_27] : memref<16x128xf32, #tpu.memory_space<vmem>>, vector<2x128xf32>
    %74 = arith.truncf %64 : vector<2x32xf32> to vector<2x32xbf16>
    %cst_28 = arith.constant dense<0.000000e+00> : vector<2x128xf32>
    %75 = tpu.matmul %74, %14, %cst_28 {dimension_numbers = #tpu.dot_dimension_numbers<[1], [0], [0], [1], [0, 0, 1, 1], [], []>} : vector<2x32xbf16>, vector<32x128xbf16>, vector<2x128xf32> -> vector<2x128xf32>
    %76 = arith.addf %73, %75 : vector<2x128xf32>
    %77 = arith.negf %76 : vector<2x128xf32>
    %78 = math.exp %77 : vector<2x128xf32>
    %cst_29 = arith.constant 1.000000e+00 : f32
    %79 = vector.broadcast %cst_29 : f32 to vector<2x128xf32>
    %80 = arith.addf %79, %78 : vector<2x128xf32>
    %81 = arith.divf %79, %80 : vector<2x128xf32>
    %82 = math.tanh %76 : vector<2x128xf32>
    %83 = vector.extract_strided_slice %81 {offsets = [0, 0], sizes = [2, 32], strides = [1, 1]} : vector<2x128xf32> to vector<2x32xf32>
    %84 = vector.extract_strided_slice %81 {offsets = [0, 32], sizes = [2, 32], strides = [1, 1]} : vector<2x128xf32> to vector<2x32xf32>
    %85 = vector.extract_strided_slice %82 {offsets = [0, 64], sizes = [2, 32], strides = [1, 1]} : vector<2x128xf32> to vector<2x32xf32>
    %86 = vector.extract_strided_slice %81 {offsets = [0, 96], sizes = [2, 32], strides = [1, 1]} : vector<2x128xf32> to vector<2x32xf32>
    %87 = arith.mulf %84, %62 : vector<2x32xf32>
    %88 = arith.mulf %83, %85 : vector<2x32xf32>
    %89 = arith.addf %87, %88 : vector<2x32xf32>
    %90 = math.tanh %89 : vector<2x32xf32>
    %91 = arith.mulf %86, %90 : vector<2x32xf32>
    %92 = vector.broadcast %c2_i32_25 : i32 to vector<2x1xi32>
    %93 = arith.cmpi eq, %13, %92 : vector<2x1xi32>
    %94 = vector.shape_cast %93 : vector<2x1xi1> to vector<2x1xi1>
    %95 = vector.broadcast %94 : vector<2x1xi1> to vector<2x32xi1>
    %96 = arith.select %95, %91, %69 : vector<2x32xi1>, vector<2x32xf32>
    %c3_i32 = arith.constant 3 : i32
    %c2_i32_30 = arith.constant 2 : i32
    %97 = arith.muli %c3_i32, %c2_i32_30 : i32
    %98 = tpu.assume_multiple %97, 2 : i32
    %99 = arith.index_cast %98 : i32 to index
    %c0_31 = arith.constant 0 : index
    %100 = vector.load %arg11[%99, %c0_31] : memref<16x128xf32, #tpu.memory_space<vmem>>, vector<2x128xf32>
    %101 = arith.truncf %91 : vector<2x32xf32> to vector<2x32xbf16>
    %cst_32 = arith.constant dense<0.000000e+00> : vector<2x128xf32>
    %102 = tpu.matmul %101, %14, %cst_32 {dimension_numbers = #tpu.dot_dimension_numbers<[1], [0], [0], [1], [0, 0, 1, 1], [], []>} : vector<2x32xbf16>, vector<32x128xbf16>, vector<2x128xf32> -> vector<2x128xf32>
    %103 = arith.addf %100, %102 : vector<2x128xf32>
    %104 = arith.negf %103 : vector<2x128xf32>
    %105 = math.exp %104 : vector<2x128xf32>
    %cst_33 = arith.constant 1.000000e+00 : f32
    %106 = vector.broadcast %cst_33 : f32 to vector<2x128xf32>
    %107 = arith.addf %106, %105 : vector<2x128xf32>
    %108 = arith.divf %106, %107 : vector<2x128xf32>
    %109 = math.tanh %103 : vector<2x128xf32>
    %110 = vector.extract_strided_slice %108 {offsets = [0, 0], sizes = [2, 32], strides = [1, 1]} : vector<2x128xf32> to vector<2x32xf32>
    %111 = vector.extract_strided_slice %108 {offsets = [0, 32], sizes = [2, 32], strides = [1, 1]} : vector<2x128xf32> to vector<2x32xf32>
    %112 = vector.extract_strided_slice %109 {offsets = [0, 64], sizes = [2, 32], strides = [1, 1]} : vector<2x128xf32> to vector<2x32xf32>
    %113 = vector.extract_strided_slice %108 {offsets = [0, 96], sizes = [2, 32], strides = [1, 1]} : vector<2x128xf32> to vector<2x32xf32>
    %114 = arith.mulf %111, %89 : vector<2x32xf32>
    %115 = arith.mulf %110, %112 : vector<2x32xf32>
    %116 = arith.addf %114, %115 : vector<2x32xf32>
    %117 = math.tanh %116 : vector<2x32xf32>
    %118 = arith.mulf %113, %117 : vector<2x32xf32>
    %119 = vector.broadcast %c3_i32 : i32 to vector<2x1xi32>
    %120 = arith.cmpi eq, %13, %119 : vector<2x1xi32>
    %121 = vector.shape_cast %120 : vector<2x1xi1> to vector<2x1xi1>
    %122 = vector.broadcast %121 : vector<2x1xi1> to vector<2x32xi1>
    %123 = arith.select %122, %118, %96 : vector<2x32xi1>, vector<2x32xf32>
    %c4_i32 = arith.constant 4 : i32
    %c2_i32_34 = arith.constant 2 : i32
    %124 = arith.muli %c4_i32, %c2_i32_34 : i32
    %125 = tpu.assume_multiple %124, 2 : i32
    %126 = arith.index_cast %125 : i32 to index
    %c0_35 = arith.constant 0 : index
    %127 = vector.load %arg11[%126, %c0_35] : memref<16x128xf32, #tpu.memory_space<vmem>>, vector<2x128xf32>
    %128 = arith.truncf %118 : vector<2x32xf32> to vector<2x32xbf16>
    %cst_36 = arith.constant dense<0.000000e+00> : vector<2x128xf32>
    %129 = tpu.matmul %128, %14, %cst_36 {dimension_numbers = #tpu.dot_dimension_numbers<[1], [0], [0], [1], [0, 0, 1, 1], [], []>} : vector<2x32xbf16>, vector<32x128xbf16>, vector<2x128xf32> -> vector<2x128xf32>
    %130 = arith.addf %127, %129 : vector<2x128xf32>
    %131 = arith.negf %130 : vector<2x128xf32>
    %132 = math.exp %131 : vector<2x128xf32>
    %cst_37 = arith.constant 1.000000e+00 : f32
    %133 = vector.broadcast %cst_37 : f32 to vector<2x128xf32>
    %134 = arith.addf %133, %132 : vector<2x128xf32>
    %135 = arith.divf %133, %134 : vector<2x128xf32>
    %136 = math.tanh %130 : vector<2x128xf32>
    %137 = vector.extract_strided_slice %135 {offsets = [0, 0], sizes = [2, 32], strides = [1, 1]} : vector<2x128xf32> to vector<2x32xf32>
    %138 = vector.extract_strided_slice %135 {offsets = [0, 32], sizes = [2, 32], strides = [1, 1]} : vector<2x128xf32> to vector<2x32xf32>
    %139 = vector.extract_strided_slice %136 {offsets = [0, 64], sizes = [2, 32], strides = [1, 1]} : vector<2x128xf32> to vector<2x32xf32>
    %140 = vector.extract_strided_slice %135 {offsets = [0, 96], sizes = [2, 32], strides = [1, 1]} : vector<2x128xf32> to vector<2x32xf32>
    %141 = arith.mulf %138, %116 : vector<2x32xf32>
    %142 = arith.mulf %137, %139 : vector<2x32xf32>
    %143 = arith.addf %141, %142 : vector<2x32xf32>
    %144 = math.tanh %143 : vector<2x32xf32>
    %145 = arith.mulf %140, %144 : vector<2x32xf32>
    %146 = vector.broadcast %c4_i32 : i32 to vector<2x1xi32>
    %147 = arith.cmpi eq, %13, %146 : vector<2x1xi32>
    %148 = vector.shape_cast %147 : vector<2x1xi1> to vector<2x1xi1>
    %149 = vector.broadcast %148 : vector<2x1xi1> to vector<2x32xi1>
    %150 = arith.select %149, %145, %123 : vector<2x32xi1>, vector<2x32xf32>
    %c5_i32 = arith.constant 5 : i32
    %c2_i32_38 = arith.constant 2 : i32
    %151 = arith.muli %c5_i32, %c2_i32_38 : i32
    %152 = tpu.assume_multiple %151, 2 : i32
    %153 = arith.index_cast %152 : i32 to index
    %c0_39 = arith.constant 0 : index
    %154 = vector.load %arg11[%153, %c0_39] : memref<16x128xf32, #tpu.memory_space<vmem>>, vector<2x128xf32>
    %155 = arith.truncf %145 : vector<2x32xf32> to vector<2x32xbf16>
    %cst_40 = arith.constant dense<0.000000e+00> : vector<2x128xf32>
    %156 = tpu.matmul %155, %14, %cst_40 {dimension_numbers = #tpu.dot_dimension_numbers<[1], [0], [0], [1], [0, 0, 1, 1], [], []>} : vector<2x32xbf16>, vector<32x128xbf16>, vector<2x128xf32> -> vector<2x128xf32>
    %157 = arith.addf %154, %156 : vector<2x128xf32>
    %158 = arith.negf %157 : vector<2x128xf32>
    %159 = math.exp %158 : vector<2x128xf32>
    %cst_41 = arith.constant 1.000000e+00 : f32
    %160 = vector.broadcast %cst_41 : f32 to vector<2x128xf32>
    %161 = arith.addf %160, %159 : vector<2x128xf32>
    %162 = arith.divf %160, %161 : vector<2x128xf32>
    %163 = math.tanh %157 : vector<2x128xf32>
    %164 = vector.extract_strided_slice %162 {offsets = [0, 0], sizes = [2, 32], strides = [1, 1]} : vector<2x128xf32> to vector<2x32xf32>
    %165 = vector.extract_strided_slice %162 {offsets = [0, 32], sizes = [2, 32], strides = [1, 1]} : vector<2x128xf32> to vector<2x32xf32>
    %166 = vector.extract_strided_slice %163 {offsets = [0, 64], sizes = [2, 32], strides = [1, 1]} : vector<2x128xf32> to vector<2x32xf32>
    %167 = vector.extract_strided_slice %162 {offsets = [0, 96], sizes = [2, 32], strides = [1, 1]} : vector<2x128xf32> to vector<2x32xf32>
    %168 = arith.mulf %165, %143 : vector<2x32xf32>
    %169 = arith.mulf %164, %166 : vector<2x32xf32>
    %170 = arith.addf %168, %169 : vector<2x32xf32>
    %171 = math.tanh %170 : vector<2x32xf32>
    %172 = arith.mulf %167, %171 : vector<2x32xf32>
    %173 = vector.broadcast %c5_i32 : i32 to vector<2x1xi32>
    %174 = arith.cmpi eq, %13, %173 : vector<2x1xi32>
    %175 = vector.shape_cast %174 : vector<2x1xi1> to vector<2x1xi1>
    %176 = vector.broadcast %175 : vector<2x1xi1> to vector<2x32xi1>
    %177 = arith.select %176, %172, %150 : vector<2x32xi1>, vector<2x32xf32>
    %c6_i32 = arith.constant 6 : i32
    %c2_i32_42 = arith.constant 2 : i32
    %178 = arith.muli %c6_i32, %c2_i32_42 : i32
    %179 = tpu.assume_multiple %178, 2 : i32
    %180 = arith.index_cast %179 : i32 to index
    %c0_43 = arith.constant 0 : index
    %181 = vector.load %arg11[%180, %c0_43] : memref<16x128xf32, #tpu.memory_space<vmem>>, vector<2x128xf32>
    %182 = arith.truncf %172 : vector<2x32xf32> to vector<2x32xbf16>
    %cst_44 = arith.constant dense<0.000000e+00> : vector<2x128xf32>
    %183 = tpu.matmul %182, %14, %cst_44 {dimension_numbers = #tpu.dot_dimension_numbers<[1], [0], [0], [1], [0, 0, 1, 1], [], []>} : vector<2x32xbf16>, vector<32x128xbf16>, vector<2x128xf32> -> vector<2x128xf32>
    %184 = arith.addf %181, %183 : vector<2x128xf32>
    %185 = arith.negf %184 : vector<2x128xf32>
    %186 = math.exp %185 : vector<2x128xf32>
    %cst_45 = arith.constant 1.000000e+00 : f32
    %187 = vector.broadcast %cst_45 : f32 to vector<2x128xf32>
    %188 = arith.addf %187, %186 : vector<2x128xf32>
    %189 = arith.divf %187, %188 : vector<2x128xf32>
    %190 = math.tanh %184 : vector<2x128xf32>
    %191 = vector.extract_strided_slice %189 {offsets = [0, 0], sizes = [2, 32], strides = [1, 1]} : vector<2x128xf32> to vector<2x32xf32>
    %192 = vector.extract_strided_slice %189 {offsets = [0, 32], sizes = [2, 32], strides = [1, 1]} : vector<2x128xf32> to vector<2x32xf32>
    %193 = vector.extract_strided_slice %190 {offsets = [0, 64], sizes = [2, 32], strides = [1, 1]} : vector<2x128xf32> to vector<2x32xf32>
    %194 = vector.extract_strided_slice %189 {offsets = [0, 96], sizes = [2, 32], strides = [1, 1]} : vector<2x128xf32> to vector<2x32xf32>
    %195 = arith.mulf %192, %170 : vector<2x32xf32>
    %196 = arith.mulf %191, %193 : vector<2x32xf32>
    %197 = arith.addf %195, %196 : vector<2x32xf32>
    %198 = math.tanh %197 : vector<2x32xf32>
    %199 = arith.mulf %194, %198 : vector<2x32xf32>
    %200 = vector.broadcast %c6_i32 : i32 to vector<2x1xi32>
    %201 = arith.cmpi eq, %13, %200 : vector<2x1xi32>
    %202 = vector.shape_cast %201 : vector<2x1xi1> to vector<2x1xi1>
    %203 = vector.broadcast %202 : vector<2x1xi1> to vector<2x32xi1>
    %204 = arith.select %203, %199, %177 : vector<2x32xi1>, vector<2x32xf32>
    %c7_i32 = arith.constant 7 : i32
    %c2_i32_46 = arith.constant 2 : i32
    %205 = arith.muli %c7_i32, %c2_i32_46 : i32
    %206 = tpu.assume_multiple %205, 2 : i32
    %207 = arith.index_cast %206 : i32 to index
    %c0_47 = arith.constant 0 : index
    %208 = vector.load %arg11[%207, %c0_47] : memref<16x128xf32, #tpu.memory_space<vmem>>, vector<2x128xf32>
    %209 = arith.truncf %199 : vector<2x32xf32> to vector<2x32xbf16>
    %cst_48 = arith.constant dense<0.000000e+00> : vector<2x128xf32>
    %210 = tpu.matmul %209, %14, %cst_48 {dimension_numbers = #tpu.dot_dimension_numbers<[1], [0], [0], [1], [0, 0, 1, 1], [], []>} : vector<2x32xbf16>, vector<32x128xbf16>, vector<2x128xf32> -> vector<2x128xf32>
    %211 = arith.addf %208, %210 : vector<2x128xf32>
    %212 = arith.negf %211 : vector<2x128xf32>
    %213 = math.exp %212 : vector<2x128xf32>
    %cst_49 = arith.constant 1.000000e+00 : f32
    %214 = vector.broadcast %cst_49 : f32 to vector<2x128xf32>
    %215 = arith.addf %214, %213 : vector<2x128xf32>
    %216 = arith.divf %214, %215 : vector<2x128xf32>
    %217 = math.tanh %211 : vector<2x128xf32>
    %218 = vector.extract_strided_slice %216 {offsets = [0, 0], sizes = [2, 32], strides = [1, 1]} : vector<2x128xf32> to vector<2x32xf32>
    %219 = vector.extract_strided_slice %216 {offsets = [0, 32], sizes = [2, 32], strides = [1, 1]} : vector<2x128xf32> to vector<2x32xf32>
    %220 = vector.extract_strided_slice %217 {offsets = [0, 64], sizes = [2, 32], strides = [1, 1]} : vector<2x128xf32> to vector<2x32xf32>
    %221 = vector.extract_strided_slice %216 {offsets = [0, 96], sizes = [2, 32], strides = [1, 1]} : vector<2x128xf32> to vector<2x32xf32>
    %222 = arith.mulf %219, %197 : vector<2x32xf32>
    %223 = arith.mulf %218, %220 : vector<2x32xf32>
    %224 = arith.addf %222, %223 : vector<2x32xf32>
    %225 = math.tanh %224 : vector<2x32xf32>
    %226 = arith.mulf %221, %225 : vector<2x32xf32>
    %227 = vector.broadcast %c7_i32 : i32 to vector<2x1xi32>
    %228 = arith.cmpi eq, %13, %227 : vector<2x1xi32>
    %229 = vector.shape_cast %228 : vector<2x1xi1> to vector<2x1xi1>
    %230 = vector.broadcast %229 : vector<2x1xi1> to vector<2x32xi1>
    %231 = arith.select %230, %226, %204 : vector<2x32xi1>, vector<2x32xf32>
    %c8_i32 = arith.constant 8 : i32
    %232 = arith.truncf %231 : vector<2x32xf32> to vector<2x32xbf16>
    %c0_50 = arith.constant 0 : index
    %c0_51 = arith.constant 0 : index
    %233 = vector.load %arg8[%c0_50, %c0_51] : memref<32x128xbf16, #tpu.memory_space<vmem>>, vector<32x128xbf16>
    %cst_52 = arith.constant dense<0.000000e+00> : vector<2x128xf32>
    %234 = tpu.matmul %232, %233, %cst_52 {dimension_numbers = #tpu.dot_dimension_numbers<[1], [0], [0], [1], [0, 0, 1, 1], [], []>} : vector<2x32xbf16>, vector<32x128xbf16>, vector<2x128xf32> -> vector<2x128xf32>
    %c0_53 = arith.constant 0 : index
    %c0_54 = arith.constant 0 : index
    %235 = vector.load %arg9[%c0_53, %c0_54] : memref<1x128xf32, #tpu.memory_space<vmem>>, vector<1x128xf32>
    %236 = vector.broadcast %235 : vector<1x128xf32> to vector<2x128xf32>
    %237 = arith.addf %234, %236 : vector<2x128xf32>
    %c0_55 = arith.constant 0 : index
    %c0_56 = arith.constant 0 : index
    %238 = vector.load %arg10[%c0_55, %c0_56] : memref<2x128xf32, #tpu.memory_space<vmem>>, vector<2x128xf32>
    tpu.vector_store %arg10[%c0_55, %c0_56], %237 {strides = array<i32>} : memref<2x128xf32, #tpu.memory_space<vmem>>, vector<2x128xf32>,
    return
  }
  func.func @transform_0(%arg0: i32) -> (i32, i32) {
    %c0_i32 = arith.constant 0 : i32
    %c0_i32_0 = arith.constant 0 : i32
    %c0_i32_1 = arith.constant 0 : i32
    return %c0_i32, %c0_i32_0 : i32, i32
  }
  func.func @transform_1(%arg0: i32) -> (i32, i32) {
    %c0_i32 = arith.constant 0 : i32
    %c0_i32_0 = arith.constant 0 : i32
    %c0_i32_1 = arith.constant 0 : i32
    return %c0_i32, %c0_i32_0 : i32, i32
  }
  func.func @transform_2(%arg0: i32) -> (i32, i32) {
    %c0_i32 = arith.constant 0 : i32
    %c0_i32_0 = arith.constant 0 : i32
    %c0_i32_1 = arith.constant 0 : i32
    return %c0_i32, %c0_i32_0 : i32, i32
  }
  func.func @transform_3(%arg0: i32) -> (i32, i32) {
    %c0_i32 = arith.constant 0 : i32
    %c0_i32_0 = arith.constant 0 : i32
    %c0_i32_1 = arith.constant 0 : i32
    return %c0_i32, %c0_i32_0 : i32, i32
  }
  func.func @transform_4(%arg0: i32) -> (i32, i32) {
    %c0_i32 = arith.constant 0 : i32
    %c0_i32_0 = arith.constant 0 : i32
    %c0_i32_1 = arith.constant 0 : i32
    return %c0_i32, %c0_i32_0 : i32, i32
  }
  func.func @transform_5(%arg0: i32) -> (i32, i32) {
    %c0_i32 = arith.constant 0 : i32
    %c0_i32_0 = arith.constant 0 : i32
    %c0_i32_1 = arith.constant 0 : i32
    return %c0_i32, %c0_i32_0 : i32, i32
  }
  func.func @transform_6(%arg0: i32) -> (i32, i32) {
    %c0_i32 = arith.constant 0 : i32
    %c0_i32_0 = arith.constant 0 : i32
    %c0_i32_1 = arith.constant 0 : i32
    return %c0_i32, %c0_i32_0 : i32, i32
  }
  func.func @transform_7(%arg0: i32) -> (i32, i32) {
    %c0_i32 = arith.constant 0 : i32
    %c0_i32_0 = arith.constant 0 : i32
    %c0_i32_1 = arith.constant 0 : i32
    return %c0_i32, %c0_i32_0 : i32, i32
  }
  func.func @transform_8(%arg0: i32) -> (i32, i32) {
    %c0_i32 = arith.constant 0 : i32
    %c0_i32_0 = arith.constant 0 : i32
    %c0_i32_1 = arith.constant 0 : i32
    return %c0_i32, %c0_i32_0 : i32, i32
  }
  func.func @transform_9(%arg0: i32) -> (i32, i32) {
    %c0_i32 = arith.constant 0 : i32
    %c0_i32_0 = arith.constant 0 : i32
    %c0_i32_1 = arith.constant 0 : i32
    return %c0_i32, %c0_i32_0 : i32, i32
  }
}

</mosaic_0001>

<bundles_post_ra>
// kernel: tpu_custom_call.1
= control target key start
LH: loop header
LB: loop body
LE: loop exit
PB: predicated region body
PF: predicated region fallthrough
CT: control target
= control target key end

     0   :  { %14 = vsyncpa [#allocation4], 0  ;;  %s1427_s0 = inlined_call_operand.vmem [shape: s32[2,1], index: 0, kind: input, shape index: {}]   ;;  %s1428_s1 = inlined_call_operand.hbm [shape: bf16[16,64], index: 1, kind: input, shape index: {}]   ;;  %s1429_s2 = inlined_call_operand.hbm [shape: bf16[16,64], index: 2, kind: input, shape index: {}]   ;;  %s1430_s3 = inlined_call_operand.hbm [shape: bf16[64,128], index: 3, kind: input, shape index: {}]   ;;  %s1431_s4 = inlined_call_operand.hbm [shape: bf16[64,128], index: 4, kind: input, shape index: {}]   ;;  %s1432_s5 = inlined_call_operand.hbm [shape: bf16[32,128], index: 5, kind: input, shape index: {}]   ;;  %s1433_s6 = inlined_call_operand.vmem [shape: f32[1,128], index: 6, kind: input, shape index: {}]   ;;  %s1434_s7 = inlined_call_operand.hbm [shape: bf16[32,128], index: 7, kind: input, shape index: {}]   ;;  %s1435_s8 = inlined_call_operand.vmem [shape: f32[1,128], index: 8, kind: input, shape index: {}]   ;;  %s1436_s9 = inlined_call_operand.hbm [shape: f32[2,128], index: 9, kind: output, shape index: {}]  }
   0x1   :  { %15 = vsyncpa [#allocation7], 0 }
   0x2   :  { %16 = vsyncpa [#allocation10], 0 }
   0x3   :  { %17 = vsyncpa [#allocation13], 0 }
   0x4   :  { %18 = vsyncpa [#allocation5], 0  ;;  %s38_s11 = sshll.u32 %s1429_s2, 4  ;;  %s1207_s12 = smov [#allocation6]   ;;  %s39_s11 = int_to_ptr.hbm [resolvable:$true] %s38_s11 }
   0x5   :  { %s40_s13 = sshll.u32 %s1207_s12, 4  ;;  %s64_s16 = sshll.u32 %s1431_s4, 4  ;;  %s41_s13 = int_to_ptr.vmem [resolvable:$true] %s40_s13  ;;  %s65_s16 = int_to_ptr.hbm [resolvable:$true] %s64_s16 }
   0x6   :  { %s1208_s17 = smov 64   ;;  %s1209_s18 = smov 4  }
   0x7   :  { %46 = dma.hbm_to_vmem [thread:$0]  %s39_s11, 128, %s41_s13, [#allocation7], %s1208_s17, %s1208_s17, %s1209_s18  }
   0x8   :  { %s1210_s19 = smov [#allocation9]   ;;  %s25_s2 = sshll.u32 %s1428_s1, 4  ;;  %s26_s2 = int_to_ptr.hbm [resolvable:$true] %s25_s2 }
   0x9   :  { %s66_s20 = sshll.u32 %s1210_s19, 4  ;;  %s51_s24 = sshll.u32 %s1430_s3, 4  ;;  %s67_s20 = int_to_ptr.vmem [resolvable:$true] %s66_s20  ;;  %s52_s24 = int_to_ptr.hbm [resolvable:$true] %s51_s24 }
   0xa   :  { %72 = dma.hbm_to_vmem [thread:$0]  %s65_s16, 512, %s67_s20, [#allocation10], %s1208_s17, %s1208_s17, %s1209_s18  }
   0xb   :  { %s1211_s25 = smov [#allocation3]   ;;  %s1212_s27 = smov [#allocation8]  }
   0xc   :  { %s27_s26 = sshll.u32 %s1211_s25, 4  ;;  %s53_s1 = sshll.u32 %s1212_s27, 4  ;;  %s28_s26 = int_to_ptr.vmem [resolvable:$true] %s27_s26  ;;  %s54_s1 = int_to_ptr.vmem [resolvable:$true] %s53_s1 }
   0xd   :  { %33 = dma.hbm_to_vmem [thread:$0]  %s26_s2, 128, %s28_s26, [#allocation4], %s1208_s17, %s1208_s17, %s1209_s18  }
   0xe   :  { %s77_s30 = sshll.u32 %s1432_s5, 4  ;;  %s92_s11 = sshll.u32 %s1434_s7, 4  ;;  %s78_s30 = int_to_ptr.hbm [resolvable:$true] %s77_s30  ;;  %s93_s11 = int_to_ptr.hbm [resolvable:$true] %s92_s11 }
   0xf   :  { %59 = dma.hbm_to_vmem [thread:$0]  %s52_s24, 512, %s54_s1, [#allocation7], %s1208_s17, %s1208_s17, %s1209_s18  }
  0x10   :  { %s1213_s12 = smov [#allocation11]   ;;  %s1214_s14 = smov [#allocation12]  }
  0x11   :  { %s79_s13 = sshll.u32 %s1213_s12, 4  ;;  %s94_s5 = sshll.u32 %s1214_s14, 4  ;;  %s80_s13 = int_to_ptr.vmem [resolvable:$true] %s79_s13  ;;  %s95_s5 = int_to_ptr.vmem [resolvable:$true] %s94_s5 }
  0x12   :  { %85 = dma.hbm_to_vmem [thread:$0]  %s78_s30, 256, %s80_s13, [#allocation10], %s1208_s17, %s1208_s17, %s1209_s18  }
  0x13   :  { %100 = dma.hbm_to_vmem [thread:$0]  %s93_s11, 256, %s95_s5, [#allocation13], %s1208_s17, %s1208_s17, %s1209_s18  }
  0x14   :  { %1197 = dma.done.wait [#allocation4], 128  }
  0x15   :  { %1198 = vsyncadd [#allocation4], 4294967168 }
  0x16   :  { %1199 = dma.done.wait [#allocation7], 640  }
  0x17   :  { %1200 = vsyncadd [#allocation7], 4294966656 }
  0x18   :  { %1201 = dma.done.wait [#allocation10], 768  }
  0x19   :  { %1202 = vsyncadd [#allocation10], 4294966528 }
  0x1a   :  { %1203 = dma.done.wait [#allocation13], 256  }
  0x1b   :  { %1204 = vsyncadd [#allocation13], 4294967040  ;;  %v1215_v0 = vmov 0   ;;  %v944_v1 = vld [vmem:[#allocation9 + $0x18] sm:$0xff]  ;;  %v1307_v3 = vld [vmem:[#allocation11 + $0x8] sm:$0xff]  ;;  %vm177_vm0 = vcmask 523264  }
  0x1c   :  { %960 = vset.pattern.permute.xlu0 %v1215_v0  ;;  %961 = vset.pattern.permute.xlu1 %v1215_v0  ;;  %v939_v2 = vld [vmem:[#allocation8 + $0x18] sm:$0xff]  ;;  %v943_v4 = vld [vmem:[#allocation9 + $0x10] sm:$0xff]  ;;  %v1310_v6 = vld [vmem:[#allocation11] sm:$0xff]  ;;  %vm268_vm5 = vcmask 261120   ;;  %s1217_s19 = smov [#allocation14]   ;;  %s847_s2 = sshll.u32 %s1436_s9, 4  ;;  %s848_s2 = int_to_ptr.hbm [resolvable:$true] %s847_s2 }
  0x1d   :  { %962 = vset.pattern.permute.xlu2 %v1215_v0  ;;  %185 = vmatpush.bf16.msra.mxu0 %v944_v1  ;;  %v938_v5 = vld [vmem:[#allocation8 + $0x10] sm:$0xff]  ;;  %v942_v7 = vld [vmem:[#allocation9 + $0x8] sm:$0xff]  ;;  %v941_v9 = vld [vmem:[#allocation9] sm:$0xff]  ;;  %s845_s20 = sshll.u32 %s1217_s19, 4  ;;  %s846_s20 = int_to_ptr.vmem [resolvable:$true] %s845_s20 }
  0x1e   :  { %231 = vmatpush.bf16.msra.mxu1 %v939_v2  ;;  %278 = vmatpush.bf16.msra.mxu2 %v1307_v3  ;;  %v937_v8 = vld [vmem:[#allocation8 + $0x8] sm:$0xff]  ;;  %v936_v10 = vld [vmem:[#allocation8] sm:$0xff]  ;;  %v940_v11 = vld [vmem:[#allocation6] sm:$0xff] }
  0x1f   :  { %345 = vmatpush.bf16.msra.mxu3 %v1307_v3  ;;  %v935_v12 = vld [vmem:[#allocation3] sm:$0xff]  ;;  %v963_v13 = vld [vmem:[%s1433_s6] ss:$0 sm:$0xff]  ;;  %s1216_s6 = smov 32  }
  0x21   :  { %186 = vmatpush.bf16.msra.mxu0 %v943_v4 }
  0x22   :  { %232 = vmatpush.bf16.msra.mxu1 %v938_v5  ;;  %279 = vmatpush.bf16.msra.mxu2 %v1310_v6 }
  0x23   :  { %346 = vmatpush.bf16.msra.mxu3 %v1310_v6 }
  0x25   :  { %187 = vmatpush.bf16.msra.mxu0 %v942_v7  ;;  %280 = vmatmul.bf16.vlgmr.msra.gmra.mxu2 %v1215_v0 }
  0x26   :  { %412 = vmatpush.bf16.msrb.mxu2 %v1307_v3  ;;  %233 = vmatpush.bf16.msra.mxu1 %v937_v8 }
  0x27   :  { %479 = vmatpush.bf16.msrb.mxu3 %v1307_v3 }
  0x29   :  { %188 = vmatpush.bf16.msra.mxu0 %v941_v9 }
  0x2a   :  { %413 = vmatpush.bf16.msrb.mxu2 %v1310_v6  ;;  %234 = vmatpush.bf16.msra.mxu1 %v936_v10 }
  0x2b   :  { %480 = vmatpush.bf16.msrb.mxu3 %v1310_v6 }
  0x2c   :  { %880 = vmatmul.msk.bf16.vlgmr.msra.gmra.mxu0 %vm177_vm0, %v940_v11 }
  0x2d   :  { %546 = vmatpush.bf16.msrb.mxu0 %v1307_v3  ;;  %901 = vmatmul.msk.bf16.vlgmr.msra.gmra.mxu1 %vm177_vm0, %v935_v12 }
  0x2e   :  { %680 = vmatpush.bf16.msra.mxu2 %v1307_v3  ;;  %613 = vmatpush.bf16.msrb.mxu1 %v1307_v3 }
  0x31   :  { %547 = vmatpush.bf16.msrb.mxu0 %v1310_v6 }
  0x32   :  { %681 = vmatpush.bf16.msra.mxu2 %v1310_v6  ;;  %614 = vmatpush.bf16.msrb.mxu1 %v1310_v6 }
  0xa8   :  { %v281_v17 = vpop.f32.mrf.mxu2 }
  0xa9   :  { %v190_v14 = vpop.f32.mrf.mxu0 }
  0xaa   :  { %v236_v15 = vpop.f32.mrf.mxu1 }
  0xab   :  { %v237_v16 = vadd.f32 %v236_v15, %v190_v14 }
  0xad   :  { %v245_v18 = vadd.f32 %v963_v13, %v237_v16 }
  0xaf   :  { %247 = vst [vmem:[#allocation2] sm:$0xff] %v245_v18 }
  0xb0   :  { %v283_v22 = vpop.f32.mrf.mxu2 }
  0xb1   :  { %v192_v19 = vpop.f32.mrf.mxu0 }
  0xb2   :  { %v238_v20 = vpop.f32.mrf.mxu1 }
  0xb3   :  { %v239_v21 = vadd.f32 %v238_v20, %v192_v19 }
  0xb5   :  { %v246_v23 = vadd.f32 %v963_v13, %v239_v21 }
  0xb6   :  { %v255_v24 = vld [vmem:[#allocation2] sm:$0x3]  ;;  %v331_v50 = vld [vmem:[#allocation2 + $0x2] sm:$0x3]  ;;  %v398_v15 = vld [vmem:[#allocation2 + $0x4] sm:$0x3] }
  0xb7   :  { %v285_v25 = vadd.f32 %v281_v17, %v255_v24  ;;  %248 = vst [vmem:[#allocation2 + $0x8] sm:$0xff] %v246_v23 }
  0xb9   :  { %965 = vtanh.f32 %v285_v25  ;;  %v911_v27 = vmul.f32 -1.442695, %v285_v25 }
  0xbb   :  { %967 = vpow2.f32 %v911_v27 }
  0xbf   :  { %v966_v26 = vpop.eup %965 }
  0xc0   :  { %308 = vrot.lane.b32.xlu0 %v966_v26, %s1208_s17 }
  0xc1   :  { %v968_v28 = vpop.eup %967 }
  0xc2   :  { %v289_v29 = vadd.f32 1.0, %v968_v28 }
  0xc4   :  { %969 = vrcp.f32 %v289_v29  ;;  %v301_v35 = vand.u32 2147483648, %v289_v29  ;;  %vm295_vm2 = vweird.f32 %v289_v29  ;;  %v299_v36 = vand.u32 2147483647, %v289_v29 }
  0xc6   :  { %v302_v38 = vor.u32 1.1754944e-38, %v301_v35  ;;  %vm300_vm4 = vcmp.eq.f32.partialorder %v299_v36, 8.507059e+37 }
  0xca   :  { %v970_v30 = vpop.eup %969 }
  0xcb   :  { %v291_v31 = vmul.f32 %v970_v30, %v289_v29  ;;  %vm296_vm1 = vweird.f32 %v970_v30 }
  0xcc   :  { %vm297_vm3 = vmor %vm295_vm2, %vm296_vm1 }
  0xcd   :  { %v292_v32 = vsub.f32 1.0, %v291_v31 }
  0xcf   :  { %v293_v33 = vmul.f32 %v970_v30, %v292_v32 }
  0xd1   :  { %v294_v34 = vadd.f32 %v970_v30, %v293_v33 }
  0xd3   :  { %v298_v37 = vsel %vm297_vm3, %v970_v30, %v294_v34 }
  0xd4   :  { %v303_v40 = vsel %vm300_vm4, %v302_v38, %v298_v37 }
  0xd5   :  { %v306_v42 = vmul.f32 0.0, %v303_v40 }
 0x132   :  { %v309_v39 = vpop.permute.xlu0 %308 }
 0x133   :  { %v311_v41 = vmul.f32 %v309_v39, %v303_v40 }
 0x135   :  { %313 = vrot.lane.b32.xlu0 %v311_v41, %s1216_s6 }
 0x1a7   :  { %v314_v43 = vpop.permute.xlu0 %313 }
 0x1a8   :  { %v316_v44 = vadd.f32 %v314_v43, %v306_v42  ;;  %v465_v43 = vld [vmem:[#allocation2 + $0x6] sm:$0x3] }
 0x1aa   :  { %971 = vtanh.f32 %v316_v44 }
 0x1b0   :  { %v972_v45 = vpop.eup %971 }
 0x1b1   :  { %319 = vrot.lane.b32.xlu1 %v972_v45, %s1208_s17 }
 0x223   :  { %v320_v46 = vpop.permute.xlu1 %319 }
 0x224   :  { %v1332_v47 = vmul.f32 %v320_v46, %v303_v40 }
 0x226   :  { %v332_v48 = vpack.c.bf16 %v1332_v47, %v1332_v47 }
 0x228   :  { %334 = vrot.lane.b32.xlu1 %v332_v48, %s1216_s6 }
 0x29a   :  { %v335_v49 = vpop.permute.xlu1 %334 }
 0x29b   :  { %912 = vmatmul.msk.bf16.vlgmr.msra.gmra.mxu3 %vm268_vm5, %v335_v49 }
 0x29c   :  { %747 = vmatpush.bf16.msra.mxu3 %v1307_v3 }
 0x2a0   :  { %748 = vmatpush.bf16.msra.mxu3 %v1310_v6 }
 0x31e   :  { %v348_v51 = vpop.f32.mrf.mxu3 }
 0x31f   :  { %v352_v52 = vadd.f32 %v348_v51, %v331_v50 }
 0x321   :  { %973 = vtanh.f32 %v352_v52  ;;  %v913_v55 = vmul.f32 -1.442695, %v352_v52 }
 0x323   :  { %975 = vpow2.f32 %v913_v55 }
 0x326   :  { %v350_v53 = vpop.f32.mrf.mxu3 }
 0x327   :  { %v974_v54 = vpop.eup %973 }
 0x328   :  { %375 = vrot.lane.b32.xlu2 %v974_v54, %s1208_s17 }
 0x329   :  { %v976_v56 = vpop.eup %975 }
 0x32a   :  { %v356_v57 = vadd.f32 1.0, %v976_v56 }
 0x32c   :  { %977 = vrcp.f32 %v356_v57  ;;  %v368_v63 = vand.u32 2147483648, %v356_v57  ;;  %vm362_vm7 = vweird.f32 %v356_v57  ;;  %v366_v1 = vand.u32 2147483647, %v356_v57 }
 0x32e   :  { %v369_v3 = vor.u32 1.1754944e-38, %v368_v63  ;;  %vm367_vm9 = vcmp.eq.f32.partialorder %v366_v1, 8.507059e+37 }
 0x332   :  { %v978_v58 = vpop.eup %977 }
 0x333   :  { %v358_v59 = vmul.f32 %v978_v58, %v356_v57  ;;  %vm363_vm6 = vweird.f32 %v978_v58 }
 0x334   :  { %vm364_vm8 = vmor %vm362_vm7, %vm363_vm6 }
 0x335   :  { %v359_v60 = vsub.f32 1.0, %v358_v59 }
 0x337   :  { %v360_v61 = vmul.f32 %v978_v58, %v359_v60 }
 0x339   :  { %v361_v62 = vadd.f32 %v978_v58, %v360_v61 }
 0x33b   :  { %v365_v2 = vsel %vm364_vm8, %v978_v58, %v361_v62 }
 0x33c   :  { %v370_v5 = vsel %vm367_vm9, %v369_v3, %v365_v2 }
 0x33d   :  { %v373_v7 = vmul.f32 %v370_v5, %v316_v44 }
 0x382   :  { %v376_v4 = vpop.permute.xlu2 %375 }
 0x383   :  { %v378_v6 = vmul.f32 %v376_v4, %v370_v5 }
 0x385   :  { %380 = vrot.lane.b32.xlu2 %v378_v6, %s1216_s6 }
 0x3df   :  { %v381_v8 = vpop.permute.xlu2 %380 }
 0x3e0   :  { %v383_v9 = vadd.f32 %v381_v8, %v373_v7 }
 0x3e2   :  { %979 = vtanh.f32 %v383_v9 }
 0x3e8   :  { %v980_v10 = vpop.eup %979 }
 0x3e9   :  { %386 = vrot.lane.b32.xlu0 %v980_v10, %s1208_s17 }
 0x45b   :  { %v387_v11 = vpop.permute.xlu0 %386 }
 0x45c   :  { %v1343_v12 = vmul.f32 %v387_v11, %v370_v5 }
 0x45e   :  { %v399_v13 = vpack.c.bf16 %v1343_v12, %v1343_v12 }
 0x460   :  { %401 = vrot.lane.b32.xlu1 %v399_v13, %s1216_s6 }
 0x4d2   :  { %v402_v14 = vpop.permute.xlu1 %401 }
 0x4d3   :  { %914 = vmatmul.msk.bf16.vlgmr.msrb.gmra.mxu2 %vm268_vm5, %v402_v14 }
 0x556   :  { %v415_v16 = vpop.f32.mrf.mxu2 }
 0x557   :  { %v419_v17 = vadd.f32 %v415_v16, %v398_v15 }
 0x559   :  { %981 = vtanh.f32 %v419_v17  ;;  %v915_v20 = vmul.f32 -1.442695, %v419_v17 }
 0x55b   :  { %983 = vpow2.f32 %v915_v20 }
 0x55e   :  { %v417_v18 = vpop.f32.mrf.mxu2 }
 0x55f   :  { %v982_v19 = vpop.eup %981 }
 0x560   :  { %442 = vrot.lane.b32.xlu2 %v982_v19, %s1208_s17 }
 0x561   :  { %v984_v21 = vpop.eup %983 }
 0x562   :  { %v423_v22 = vadd.f32 1.0, %v984_v21 }
 0x564   :  { %985 = vrcp.f32 %v423_v22  ;;  %v435_v28 = vand.u32 2147483648, %v423_v22  ;;  %vm429_vm11 = vweird.f32 %v423_v22  ;;  %v433_v29 = vand.u32 2147483647, %v423_v22 }
 0x566   :  { %v436_v31 = vor.u32 1.1754944e-38, %v435_v28  ;;  %vm434_vm13 = vcmp.eq.f32.partialorder %v433_v29, 8.507059e+37 }
 0x56a   :  { %v986_v23 = vpop.eup %985 }
 0x56b   :  { %v425_v24 = vmul.f32 %v986_v23, %v423_v22  ;;  %vm430_vm10 = vweird.f32 %v986_v23 }
 0x56c   :  { %vm431_vm12 = vmor %vm429_vm11, %vm430_vm10 }
 0x56d   :  { %v426_v25 = vsub.f32 1.0, %v425_v24 }
 0x56f   :  { %v427_v26 = vmul.f32 %v986_v23, %v426_v25 }
 0x571   :  { %v428_v27 = vadd.f32 %v986_v23, %v427_v26 }
 0x573   :  { %v432_v30 = vsel %vm431_vm12, %v986_v23, %v428_v27 }
 0x574   :  { %v437_v33 = vsel %vm434_vm13, %v436_v31, %v432_v30 }
 0x575   :  { %v440_v35 = vmul.f32 %v437_v33, %v383_v9  ;;  %v532_v9 = vld [vmem:[#allocation2 + $0x8] sm:$0x3] }
 0x5ba   :  { %v443_v32 = vpop.permute.xlu2 %442 }
 0x5bb   :  { %v445_v34 = vmul.f32 %v443_v32, %v437_v33 }
 0x5bd   :  { %447 = vrot.lane.b32.xlu0 %v445_v34, %s1216_s6 }
 0x62f   :  { %v448_v36 = vpop.permute.xlu0 %447 }
 0x630   :  { %v450_v37 = vadd.f32 %v448_v36, %v440_v35 }
 0x632   :  { %987 = vtanh.f32 %v450_v37 }
 0x638   :  { %v988_v38 = vpop.eup %987 }
 0x639   :  { %453 = vrot.lane.b32.xlu1 %v988_v38, %s1208_s17  ;;  %v599_v38 = vld [vmem:[#allocation2 + $0xa] sm:$0x3] }
 0x6ab   :  { %v454_v39 = vpop.permute.xlu1 %453 }
 0x6ac   :  { %v1352_v40 = vmul.f32 %v454_v39, %v437_v33 }
 0x6ae   :  { %v466_v41 = vpack.c.bf16 %v1352_v40, %v1352_v40 }
 0x6b0   :  { %468 = vrot.lane.b32.xlu2 %v466_v41, %s1216_s6 }
 0x70a   :  { %v469_v42 = vpop.permute.xlu2 %468 }
 0x70b   :  { %916 = vmatmul.msk.bf16.vlgmr.msrb.gmra.mxu3 %vm268_vm5, %v469_v42 }
 0x78e   :  { %v482_v44 = vpop.f32.mrf.mxu3 }
 0x78f   :  { %v486_v45 = vadd.f32 %v482_v44, %v465_v43 }
 0x791   :  { %989 = vtanh.f32 %v486_v45  ;;  %v917_v49 = vmul.f32 -1.442695, %v486_v45 }
 0x793   :  { %991 = vpow2.f32 %v917_v49 }
 0x796   :  { %v484_v46 = vpop.f32.mrf.mxu3 }
 0x797   :  { %v990_v48 = vpop.eup %989 }
 0x798   :  { %509 = vrot.lane.b32.xlu0 %v990_v48, %s1208_s17 }
 0x799   :  { %v992_v50 = vpop.eup %991 }
 0x79a   :  { %v490_v51 = vadd.f32 1.0, %v992_v50 }
 0x79c   :  { %993 = vrcp.f32 %v490_v51  ;;  %v502_v57 = vand.u32 2147483648, %v490_v51  ;;  %vm496_vm15 = vweird.f32 %v490_v51  ;;  %v500_v58 = vand.u32 2147483647, %v490_v51 }
 0x79e   :  { %v503_v60 = vor.u32 1.1754944e-38, %v502_v57  ;;  %vm501_vm1 = vcmp.eq.f32.partialorder %v500_v58, 8.507059e+37 }
 0x7a2   :  { %v994_v52 = vpop.eup %993 }
 0x7a3   :  { %v492_v53 = vmul.f32 %v994_v52, %v490_v51  ;;  %vm497_vm14 = vweird.f32 %v994_v52 }
 0x7a4   :  { %vm498_vm0 = vmor %vm496_vm15, %vm497_vm14 }
 0x7a5   :  { %v493_v54 = vsub.f32 1.0, %v492_v53 }
 0x7a7   :  { %v494_v55 = vmul.f32 %v994_v52, %v493_v54 }
 0x7a9   :  { %v495_v56 = vadd.f32 %v994_v52, %v494_v55 }
 0x7ab   :  { %v499_v59 = vsel %vm498_vm0, %v994_v52, %v495_v56 }
 0x7ac   :  { %v504_v62 = vsel %vm501_vm1, %v503_v60, %v499_v59 }
 0x7ad   :  { %v507_v1 = vmul.f32 %v504_v62, %v450_v37 }
 0x80a   :  { %v510_v61 = vpop.permute.xlu0 %509 }
 0x80b   :  { %v512_v63 = vmul.f32 %v510_v61, %v504_v62 }
 0x80d   :  { %514 = vrot.lane.b32.xlu1 %v512_v63, %s1216_s6 }
 0x87f   :  { %v515_v2 = vpop.permute.xlu1 %514 }
 0x880   :  { %v517_v3 = vadd.f32 %v515_v2, %v507_v1 }
 0x882   :  { %995 = vtanh.f32 %v517_v3 }
 0x888   :  { %v996_v4 = vpop.eup %995 }
 0x889   :  { %520 = vrot.lane.b32.xlu2 %v996_v4, %s1208_s17 }
 0x8e3   :  { %v521_v5 = vpop.permute.xlu2 %520 }
 0x8e4   :  { %v1361_v6 = vmul.f32 %v521_v5, %v504_v62  ;;  %v666_v5 = vld [vmem:[#allocation2 + $0xc] sm:$0x3] }
 0x8e6   :  { %v533_v7 = vpack.c.bf16 %v1361_v6, %v1361_v6 }
 0x8e8   :  { %535 = vrot.lane.b32.xlu0 %v533_v7, %s1216_s6 }
 0x95a   :  { %v536_v8 = vpop.permute.xlu0 %535 }
 0x95b   :  { %918 = vmatmul.msk.bf16.vlgmr.msrb.gmra.mxu0 %vm268_vm5, %v536_v8 }
 0x9d8   :  { %v549_v10 = vpop.f32.mrf.mxu0 }
 0x9d9   :  { %v553_v11 = vadd.f32 %v549_v10, %v532_v9 }
 0x9db   :  { %997 = vtanh.f32 %v553_v11  ;;  %v919_v15 = vmul.f32 -1.442695, %v553_v11 }
 0x9dd   :  { %999 = vpow2.f32 %v919_v15 }
 0x9e0   :  { %v551_v13 = vpop.f32.mrf.mxu0 }
 0x9e1   :  { %v998_v14 = vpop.eup %997 }
 0x9e2   :  { %576 = vrot.lane.b32.xlu1 %v998_v14, %s1208_s17 }
 0x9e3   :  { %v1000_v16 = vpop.eup %999 }
 0x9e4   :  { %v557_v17 = vadd.f32 1.0, %v1000_v16 }
 0x9e6   :  { %1001 = vrcp.f32 %v557_v17  ;;  %v569_v23 = vand.u32 2147483648, %v557_v17  ;;  %vm563_vm3 = vweird.f32 %v557_v17  ;;  %v567_v24 = vand.u32 2147483647, %v557_v17 }
 0x9e8   :  { %v570_v26 = vor.u32 1.1754944e-38, %v569_v23  ;;  %vm568_vm6 = vcmp.eq.f32.partialorder %v567_v24, 8.507059e+37 }
 0x9ec   :  { %v1002_v18 = vpop.eup %1001 }
 0x9ed   :  { %v559_v19 = vmul.f32 %v1002_v18, %v557_v17  ;;  %vm564_vm2 = vweird.f32 %v1002_v18 }
 0x9ee   :  { %vm565_vm4 = vmor %vm563_vm3, %vm564_vm2 }
 0x9ef   :  { %v560_v20 = vsub.f32 1.0, %v559_v19 }
 0x9f1   :  { %v561_v21 = vmul.f32 %v1002_v18, %v560_v20 }
 0x9f3   :  { %v562_v22 = vadd.f32 %v1002_v18, %v561_v21 }
 0x9f5   :  { %v566_v25 = vsel %vm565_vm4, %v1002_v18, %v562_v22 }
 0x9f6   :  { %v571_v28 = vsel %vm568_vm6, %v570_v26, %v566_v25 }
 0x9f7   :  { %v574_v30 = vmul.f32 %v571_v28, %v517_v3 }
 0xa54   :  { %v577_v27 = vpop.permute.xlu1 %576 }
 0xa55   :  { %v579_v29 = vmul.f32 %v577_v27, %v571_v28 }
 0xa57   :  { %581 = vrot.lane.b32.xlu2 %v579_v29, %s1216_s6 }
 0xab1   :  { %v582_v31 = vpop.permute.xlu2 %581 }
 0xab2   :  { %v584_v32 = vadd.f32 %v582_v31, %v574_v30 }
 0xab4   :  { %1003 = vtanh.f32 %v584_v32 }
 0xaba   :  { %v1004_v33 = vpop.eup %1003 }
 0xabb   :  { %587 = vrot.lane.b32.xlu0 %v1004_v33, %s1208_s17 }
 0xb2d   :  { %v588_v34 = vpop.permute.xlu0 %587 }
 0xb2e   :  { %v1370_v35 = vmul.f32 %v588_v34, %v571_v28 }
 0xb30   :  { %v600_v36 = vpack.c.bf16 %v1370_v35, %v1370_v35 }
 0xb32   :  { %602 = vrot.lane.b32.xlu1 %v600_v36, %s1216_s6 }
 0xba4   :  { %v603_v37 = vpop.permute.xlu1 %602 }
 0xba5   :  { %920 = vmatmul.msk.bf16.vlgmr.msrb.gmra.mxu1 %vm268_vm5, %v603_v37 }
 0xc22   :  { %v616_v39 = vpop.f32.mrf.mxu1 }
 0xc23   :  { %v620_v41 = vadd.f32 %v616_v39, %v599_v38 }
 0xc25   :  { %1005 = vtanh.f32 %v620_v41  ;;  %v921_v44 = vmul.f32 -1.442695, %v620_v41  ;;  %v733_v41 = vld [vmem:[#allocation2 + $0xe] sm:$0x3] }
 0xc27   :  { %1007 = vpow2.f32 %v921_v44 }
 0xc2a   :  { %v618_v42 = vpop.f32.mrf.mxu1 }
 0xc2b   :  { %v1006_v43 = vpop.eup %1005 }
 0xc2c   :  { %643 = vrot.lane.b32.xlu2 %v1006_v43, %s1208_s17 }
 0xc2d   :  { %v1008_v45 = vpop.eup %1007 }
 0xc2e   :  { %v624_v46 = vadd.f32 1.0, %v1008_v45 }
 0xc30   :  { %1009 = vrcp.f32 %v624_v46  ;;  %v636_v53 = vand.u32 2147483648, %v624_v46  ;;  %vm630_vm8 = vweird.f32 %v624_v46  ;;  %v634_v54 = vand.u32 2147483647, %v624_v46 }
 0xc32   :  { %v637_v56 = vor.u32 1.1754944e-38, %v636_v53  ;;  %vm635_vm10 = vcmp.eq.f32.partialorder %v634_v54, 8.507059e+37 }
 0xc36   :  { %v1010_v48 = vpop.eup %1009 }
 0xc37   :  { %v626_v49 = vmul.f32 %v1010_v48, %v624_v46  ;;  %vm631_vm7 = vweird.f32 %v1010_v48 }
 0xc38   :  { %vm632_vm9 = vmor %vm630_vm8, %vm631_vm7 }
 0xc39   :  { %v627_v50 = vsub.f32 1.0, %v626_v49 }
 0xc3b   :  { %v628_v51 = vmul.f32 %v1010_v48, %v627_v50 }
 0xc3d   :  { %v629_v52 = vadd.f32 %v1010_v48, %v628_v51 }
 0xc3f   :  { %v633_v55 = vsel %vm632_vm9, %v1010_v48, %v629_v52 }
 0xc40   :  { %v638_v58 = vsel %vm635_vm10, %v637_v56, %v633_v55 }
 0xc41   :  { %v641_v60 = vmul.f32 %v638_v58, %v584_v32  ;;  %v249_v32 = vld [vmem:[%s1427_s0] sm:$0x3] }
 0xc42   :  { %v902_v36 = vadd.s32 4294967295, %v249_v32 }
 0xc44   :  { %vm323_vm15 = vcmp.eq.s32.totalorder %v902_v36, 0  ;;  %vm658_vm0 = vcmp.eq.s32.totalorder %v902_v36, 5  ;;  %vm390_vm1 = vcmp.eq.s32.totalorder %v902_v36, 1  ;;  %vm524_vm2 = vcmp.eq.s32.totalorder %v902_v36, 3 }
 0xc45   :  { %v324_v37 = vsel %vm323_vm15, 1, %v1215_v0  ;;  %v659_v39 = vsel %vm658_vm0, 1, %v1215_v0  ;;  %v391_v46 = vsel %vm390_vm1, 1, %v1215_v0  ;;  %v525_v48 = vsel %vm524_vm2, 1, %v1215_v0 }
 0xc46   :  { %vm725_vm3 = vcmp.eq.s32.totalorder %v902_v36, 6  ;;  %vm792_vm4 = vcmp.eq.s32.totalorder %v902_v36, 7  ;;  %vm457_vm10 = vcmp.eq.s32.totalorder %v902_v36, 2 }
 0xc47   :  { %v726_v49 = vsel %vm725_vm3, 1, %v1215_v0  ;;  %v793_v56 = vsel %vm792_vm4, 1, %v1215_v0 }
 0xc86   :  { %v644_v57 = vpop.permute.xlu2 %643 }
 0xc87   :  { %v646_v59 = vmul.f32 %v644_v57, %v638_v58 }
 0xc89   :  { %648 = vrot.lane.b32.xlu0 %v646_v59, %s1216_s6 }
 0xcfb   :  { %v649_v61 = vpop.permute.xlu0 %648 }
 0xcfc   :  { %v651_v62 = vadd.f32 %v649_v61, %v641_v60 }
 0xcfe   :  { %1011 = vtanh.f32 %v651_v62 }
 0xd04   :  { %v1012_v63 = vpop.eup %1011 }
 0xd05   :  { %654 = vrot.lane.b32.xlu1 %v1012_v63, %s1208_s17 }
 0xd77   :  { %v655_v1 = vpop.permute.xlu1 %654 }
 0xd78   :  { %v1379_v2 = vmul.f32 %v655_v1, %v638_v58 }
 0xd7a   :  { %v667_v3 = vpack.c.bf16 %v1379_v2, %v1379_v2 }
 0xd7c   :  { %669 = vrot.lane.b32.xlu2 %v667_v3, %s1216_s6 }
 0xdd6   :  { %v670_v4 = vpop.permute.xlu2 %669 }
 0xdd7   :  { %922 = vmatmul.msk.bf16.vlgmr.msra.gmra.mxu2 %vm268_vm5, %v670_v4  ;;  %v458_v4 = vsel %vm457_vm10, 1, %v1215_v0 }
 0xe5a   :  { %v683_v7 = vpop.f32.mrf.mxu2 }
 0xe5b   :  { %v687_v8 = vadd.f32 %v683_v7, %v666_v5 }
 0xe5d   :  { %1013 = vtanh.f32 %v687_v8  ;;  %v923_v11 = vmul.f32 -1.442695, %v687_v8 }
 0xe5f   :  { %1015 = vpow2.f32 %v923_v11  ;;  %v948_v11 = vld [vmem:[#allocation12 + $0x8] sm:$0xff] }
 0xe60   :  { %832 = vmatpush.bf16.msra.mxu0 %v948_v11 }
 0xe62   :  { %v685_v9 = vpop.f32.mrf.mxu2 }
 0xe63   :  { %v1014_v10 = vpop.eup %1013 }
 0xe64   :  { %710 = vrot.lane.b32.xlu0 %v1014_v10, %s1208_s17 }
 0xe65   :  { %v1016_v13 = vpop.eup %1015 }
 0xe66   :  { %v691_v14 = vadd.f32 1.0, %v1016_v13  ;;  %v947_v13 = vld [vmem:[#allocation12] sm:$0xff] }
 0xe67   :  { %833 = vmatpush.bf16.msra.mxu0 %v947_v13 }
 0xe68   :  { %1017 = vrcp.f32 %v691_v14  ;;  %v703_v20 = vand.u32 2147483648, %v691_v14  ;;  %vm697_vm12 = vweird.f32 %v691_v14  ;;  %v701_v21 = vand.u32 2147483647, %v691_v14 }
 0xe6a   :  { %v704_v23 = vor.u32 1.1754944e-38, %v703_v20  ;;  %vm702_vm14 = vcmp.eq.f32.partialorder %v701_v21, 8.507059e+37 }
 0xe6e   :  { %v1018_v15 = vpop.eup %1017 }
 0xe6f   :  { %v693_v16 = vmul.f32 %v1018_v15, %v691_v14  ;;  %vm698_vm11 = vweird.f32 %v1018_v15 }
 0xe70   :  { %vm699_vm13 = vmor %vm697_vm12, %vm698_vm11  ;;  %vm591_vm11 = vcmp.eq.s32.totalorder %v902_v36, 4 }
 0xe71   :  { %v694_v17 = vsub.f32 1.0, %v693_v16  ;;  %v592_v5 = vsel %vm591_vm11, 1, %v1215_v0 }
 0xe73   :  { %v695_v18 = vmul.f32 %v1018_v15, %v694_v17 }
 0xe75   :  { %v696_v19 = vadd.f32 %v1018_v15, %v695_v18 }
 0xe77   :  { %v700_v22 = vsel %vm699_vm13, %v1018_v15, %v696_v19 }
 0xe78   :  { %v705_v25 = vsel %vm702_vm14, %v704_v23, %v700_v22 }
 0xe79   :  { %v708_v27 = vmul.f32 %v705_v25, %v651_v62 }
 0xed6   :  { %v711_v24 = vpop.permute.xlu0 %710 }
 0xed7   :  { %v713_v26 = vmul.f32 %v711_v24, %v705_v25 }
 0xed9   :  { %715 = vrot.lane.b32.xlu1 %v713_v26, %s1216_s6 }
 0xf4b   :  { %v716_v28 = vpop.permute.xlu1 %715 }
 0xf4c   :  { %v1387_v29 = vadd.f32 %v716_v28, %v708_v27 }
 0xf4e   :  { %1019 = vtanh.f32 %v1387_v29 }
 0xf54   :  { %v1020_v30 = vpop.eup %1019 }
 0xf55   :  { %721 = vrot.lane.b32.xlu2 %v1020_v30, %s1208_s17 }
 0xfaf   :  { %v722_v31 = vpop.permute.xlu2 %721 }
 0xfb0   :  { %v1394_v33 = vmul.f32 %v722_v31, %v705_v25 }
 0xfb2   :  { %v734_v34 = vpack.c.bf16 %v1394_v33, %v1394_v33 }
 0xfb4   :  { %736 = vrot.lane.b32.xlu0 %v734_v34, %s1216_s6 }
 0xfbc   :  { %326 = vperm.xlu0 %960, %v324_v37  }
 0xfc4   :  { %661 = vperm.xlu0 %960, %v659_v39  }
 0xfcc   :  { %795 = vperm.xlu0 %960, %v793_v56  }
0x1026   :  { %v737_v38 = vpop.permute.xlu0 %736 }
0x1027   :  { %924 = vmatmul.msk.bf16.vlgmr.msra.gmra.mxu3 %vm268_vm5, %v737_v38 }
0x102e   :  { %v327_v16 = vpop.permute.xlu0 %326 }
0x102f   :  { %vm328_vm12 = vcmp.eq.s32.totalorder %v327_v16, 1 }
0x1030   :  { %v329_v0 = vsel %vm328_vm12, %v1332_v47, 0.0 }
0x1036   :  { %v662_v20 = vpop.permute.xlu0 %661 }
0x1037   :  { %vm663_vm1 = vcmp.eq.s32.totalorder %v662_v20, 1 }
0x103e   :  { %v796_v26 = vpop.permute.xlu0 %795 }
0x103f   :  { %vm797_vm3 = vcmp.eq.s32.totalorder %v796_v26, 1 }
0x10aa   :  { %v750_v42 = vpop.f32.mrf.mxu3 }
0x10ab   :  { %v754_v43 = vadd.f32 %v750_v42, %v733_v41 }
0x10ad   :  { %1021 = vtanh.f32 %v754_v43  ;;  %v925_v50 = vmul.f32 -1.442695, %v754_v43 }
0x10af   :  { %1023 = vpow2.f32 %v925_v50 }
0x10b2   :  { %v752_v44 = vpop.f32.mrf.mxu3 }
0x10b3   :  { %v1022_v45 = vpop.eup %1021 }
0x10b4   :  { %777 = vrot.lane.b32.xlu1 %v1022_v45, %s1208_s17 }
0x10b5   :  { %v1024_v51 = vpop.eup %1023 }
0x10b6   :  { %v758_v52 = vadd.f32 1.0, %v1024_v51 }
0x10b8   :  { %1025 = vrcp.f32 %v758_v52  ;;  %v770_v59 = vand.u32 2147483648, %v758_v52  ;;  %vm764_vm7 = vweird.f32 %v758_v52  ;;  %v768_v60 = vand.u32 2147483647, %v758_v52 }
0x10ba   :  { %v771_v62 = vor.u32 1.1754944e-38, %v770_v59  ;;  %vm769_vm9 = vcmp.eq.f32.partialorder %v768_v60, 8.507059e+37 }
0x10bc   :  { %393 = vperm.xlu1 %961, %v391_v46  }
0x10be   :  { %v1026_v53 = vpop.eup %1025 }
0x10bf   :  { %v760_v54 = vmul.f32 %v1026_v53, %v758_v52  ;;  %vm765_vm6 = vweird.f32 %v1026_v53 }
0x10c0   :  { %vm766_vm8 = vmor %vm764_vm7, %vm765_vm6 }
0x10c1   :  { %v761_v55 = vsub.f32 1.0, %v760_v54 }
0x10c3   :  { %v762_v57 = vmul.f32 %v1026_v53, %v761_v55 }
0x10c4   :  { %527 = vperm.xlu1 %961, %v525_v48  }
0x10c5   :  { %v763_v58 = vadd.f32 %v1026_v53, %v762_v57 }
0x10c7   :  { %v767_v61 = vsel %vm766_vm8, %v1026_v53, %v763_v58 }
0x10c8   :  { %v772_v1 = vsel %vm769_vm9, %v771_v62, %v767_v61 }
0x10c9   :  { %v775_v7 = vmul.f32 %v772_v1, %v1387_v29 }
0x10cc   :  { %728 = vperm.xlu1 %961, %v726_v49  }
0x1126   :  { %v778_v63 = vpop.permute.xlu1 %777 }
0x1127   :  { %v780_v3 = vmul.f32 %v778_v63, %v772_v1 }
0x1129   :  { %782 = vrot.lane.b32.xlu2 %v780_v3, %s1216_s6 }
0x112e   :  { %v394_v14 = vpop.permute.xlu1 %393 }
0x112f   :  { %vm395_vm13 = vcmp.eq.s32.totalorder %v394_v14, 1 }
0x1130   :  { %v396_v19 = vsel %vm395_vm13, %v1343_v12, %v329_v0 }
0x1131   :  { %460 = vperm.xlu2 %962, %v458_v4  }
0x1136   :  { %v528_v17 = vpop.permute.xlu1 %527 }
0x1137   :  { %vm529_vm15 = vcmp.eq.s32.totalorder %v528_v17, 1 }
0x1139   :  { %594 = vperm.xlu2 %962, %v592_v5  }
0x113e   :  { %v729_v24 = vpop.permute.xlu1 %728 }
0x113f   :  { %vm730_vm2 = vcmp.eq.s32.totalorder %v729_v24, 1 }
0x1183   :  { %v783_v8 = vpop.permute.xlu2 %782 }
0x1184   :  { %v785_v9 = vadd.f32 %v783_v8, %v775_v7 }
0x1186   :  { %1027 = vtanh.f32 %v785_v9 }
0x118b   :  { %v461_v15 = vpop.permute.xlu2 %460 }
0x118c   :  { %v1028_v10 = vpop.eup %1027  ;;  %vm462_vm14 = vcmp.eq.s32.totalorder %v461_v15, 1 }
0x118d   :  { %788 = vrot.lane.b32.xlu2 %v1028_v10, %s1208_s17  ;;  %v463_v21 = vsel %vm462_vm14, %v1352_v40, %v396_v19 }
0x118e   :  { %v530_v22 = vsel %vm529_vm15, %v1361_v6, %v463_v21  ;;  %v964_v6 = vld [vmem:[%s1435_s8] ss:$0 sm:$0xff] }
0x1193   :  { %v595_v18 = vpop.permute.xlu2 %594 }
0x1194   :  { %vm596_vm0 = vcmp.eq.s32.totalorder %v595_v18, 1 }
0x1195   :  { %v597_v23 = vsel %vm596_vm0, %v1370_v35, %v530_v22 }
0x1196   :  { %v664_v25 = vsel %vm663_vm1, %v1379_v2, %v597_v23 }
0x1197   :  { %v731_v28 = vsel %vm730_vm2, %v1394_v33, %v664_v25 }
0x11e7   :  { %v789_v27 = vpop.permute.xlu2 %788 }
0x11e8   :  { %v791_v47 = vmul.f32 %v789_v27, %v772_v1 }
0x11ea   :  { %v798_v12 = vsel %vm797_vm3, %v791_v47, %v731_v28 }
0x11eb   :  { %v799_v29 = vpack.c.bf16 %v798_v12, %v798_v12 }
0x11ed   :  { %809 = vrot.lane.b32.xlu1 %v799_v29, %s1216_s6 }
0x125f   :  { %v810_v40 = vpop.permute.xlu1 %809 }
0x1260   :  { %934 = vmatmul.msk.bf16.vlgmr.msra.gmra.mxu0 %vm268_vm5, %v810_v40 }
0x12dd   :  { %v835_v35 = vpop.f32.mrf.mxu0 }
0x12de   :  { %v836_v2 = vadd.f32 %v964_v6, %v835_v35 }
0x12e0   :  { %839 = vst [vmem:[#allocation14] sm:$0x3] %v836_v2 }
0x12e1   :  { %850 = dma.vmem_to_hbm [thread:$0]  %s846_s20, 32, %s848_s2, [#allocation5]  }
0x12e5   :  { %v837_v30 = vpop.f32.mrf.mxu0 }
0x12e6   :  { %1205 = dma.done.wait [#allocation5], 32  }
0x12e7   :  { %1206 = vsyncadd [#allocation5], 4294967264 }
0x12e8   :  { %855 = vsyncpa [#allocation4], 1 }
0x12e9   :  { %856 = vsyncpa [#allocation7], 1 }
0x12ea   :  { %857 = vsyncpa [#allocation10], 1 }
0x12eb   :  { %858 = vsyncpa [#allocation13], 1 }
0x12ec   :  { %859 = vsyncpa [#allocation5], 1 }

</bundles_post_ra>
